<compile_context>
chip_gen: v5e
topology: v5e:2x2
jax: 0.10.0
libtpu: 0.0.40
codegen_flags: <defaults>
</compile_context>

<pallas_src>
import math

import jax
import jax.numpy as jnp
from jax.experimental import pallas as pl
from jax.experimental.pallas import tpu as pltpu


def _round_up(x, m):
    return (x + m - 1) // m * m


def _pad2d(a, rows, cols):
    r, c = a.shape
    if r == rows and c == cols:
        return a
    return jnp.pad(a, ((0, rows - r), (0, cols - c)))


def _gelu_tanh(x):
    # BERT GELU: 0.5 * x * (1 + tanh(sqrt(2/pi) * (x + 0.044715 x^3)))
    c = math.sqrt(2.0 / math.pi)
    return 0.5 * x * (1.0 + jnp.tanh(c * (x + 0.044715 * x * x * x)))


# ----------------------------- kernels --------------------------------------


def ffn_resident_kernel(x_ref, w1_ref, b1_ref, w2_ref, b2_ref, o_ref):
    """Weight-resident schedule. Grid: (row tiles,). W1/W2 DMA'd once."""
    h = jnp.dot(x_ref[...], w1_ref[...], preferred_element_type=jnp.float32)
    h = h + b1_ref[...].astype(jnp.float32)          # (tm, Fp) f32
    g = _gelu_tanh(h)                                # tanh rides the EUP
    # TODO(synk): dropout (p=0.1) is identity in eval mode; a training-mode
    # mask would use pltpu.prng_seed / pltpu.prng_random_bits.
    out = jnp.dot(g.astype(w2_ref.dtype), w2_ref[...],
                  preferred_element_type=jnp.float32)
    o_ref[...] = (out + b2_ref[...].astype(jnp.float32)).astype(o_ref.dtype)


def ffn_streaming_kernel(x_ref, w1_ref, b1_ref, w2_ref, b2_ref, o_ref, acc_ref):
    """Streaming schedule. Grid: (row tiles 'parallel', d_ff slabs 'arbitrary')."""
    fi = pl.program_id(1)

    h = jnp.dot(x_ref[...], w1_ref[...], preferred_element_type=jnp.float32)
    h = h + b1_ref[...].astype(jnp.float32)          # (tm, tf) f32
    g = _gelu_tanh(h)
    partial = jnp.dot(g.astype(w2_ref.dtype), w2_ref[...],
                      preferred_element_type=jnp.float32)

    @pl.when(fi == 0)
    def _():
        # Direct store of the first partial with b2 folded in: no zero-init RMW.
        acc_ref[...] = partial + b2_ref[...].astype(jnp.float32)

    @pl.when(fi > 0)
    def _():
        acc_ref[...] += partial

    @pl.when(fi == pl.num_programs(1) - 1)
    def _():
        o_ref[...] = acc_ref[...].astype(o_ref.dtype)


# ----------------------------- wrapper ---------------------------------------


def _vmem_capacity_bytes():
    try:
        return int(pltpu.get_tpu_info().vmem_capacity_bytes)
    except Exception:
        return 64 * 1024 * 1024      # conservative: v7x per-TC VMEM


def _pick_tf(Fp, tf_req):
    """Largest multiple-of-128 exact divisor of Fp that is <= tf_req."""
    k = Fp // 128
    best = 128
    for d in range(1, k + 1):
        if k % d == 0 and d * 128 <= tf_req:
            best = d * 128
    return best


def positionwise_ffn(x, w1, b1, w2, b2, *, tm=1024, tf=1024,
                     force_streaming=False):
    """x: (B, S, H). w1: (H, F), b1: (F,), w2: (F, H), b2: (H,)."""
    B, S, H = x.shape
    F = w1.shape[1]
    M = B * S

    Hp = _round_up(H, 128)
    Fp = _round_up(F, 128)

    # Parameter padding (lane-aligned). For 128-multiple H/F this is a no-op;
    # in a real training/inference loop hoist this out of the per-step path.
    w1p = _pad2d(w1, Hp, Fp)
    b1p = _pad2d(b1.reshape(1, F).astype(jnp.float32), 1, Fp)
    w2p = _pad2d(w2, Fp, Hp)
    b2p = _pad2d(b2.reshape(1, H).astype(jnp.float32), 1, Hp)

    # Rows are NOT zero-padded: the row grid uses pl.cdiv and Pallas masks the
    # ragged tail block. Only the reduction-facing H dim of x is padded.
    x2d = _pad2d(x.reshape(M, H), M, Hp)

    xi = jnp.dtype(x.dtype).itemsize
    wi = jnp.dtype(w1.dtype).itemsize

    vmem_cap = _vmem_capacity_bytes()
    vmem_budget = int(vmem_cap * 0.75)           # headroom for compiler temps
    vmem_limit = int(min(vmem_cap, 100 * 1024 * 1024))

    # Row tile: large by default (sets arithmetic intensity when streaming).
    tm = max(8, min(_round_up(tm, 8), _round_up(M, 8)))

    def resident_bytes(tm_):
        return ((Hp * Fp + Fp * Hp) * wi + (Fp + Hp) * 4   # resident W1/W2/b1/b2
                + 2 * tm_ * Hp * xi                        # x, double-buffered
                + 2 * tm_ * Hp * xi                        # out, double-buffered
                + 2 * tm_ * Fp * 4)                        # f32 h/g intermediates

    use_resident = (not force_streaming) and resident_bytes(tm) <= vmem_budget

    grid_m = pl.cdiv(M, tm)
    flops = 4 * M * Hp * Fp                 # two matmuls, 2 flops per MAC
    transc = M * Fp                         # one tanh per hidden activation

    if use_resident:
        cost = pl.CostEstimate(
            flops=flops, transcendentals=transc,
            bytes_accessed=(M * Hp * xi            # x in
                            + 2 * Hp * Fp * wi     # W1 + W2 exactly once
                            + M * Hp * xi))        # out
        out = pl.pallas_call(
            ffn_resident_kernel,
            out_shape=jax.ShapeDtypeStruct((M, Hp), x.dtype),
            grid_spec=pltpu.PrefetchScalarGridSpec(
                num_scalar_prefetch=0,
                grid=(grid_m,),
                in_specs=[
                    pl.BlockSpec((tm, Hp), lambda i: (i, 0)),   # x row tile
                    pl.BlockSpec((Hp, Fp), lambda i: (0, 0)),   # W1 (resident)
                    pl.BlockSpec((1, Fp), lambda i: (0, 0)),    # b1 (resident)
                    pl.BlockSpec((Fp, Hp), lambda i: (0, 0)),   # W2 (resident)
                    pl.BlockSpec((1, Hp), lambda i: (0, 0)),    # b2 (resident)
                ],
                out_specs=pl.BlockSpec((tm, Hp), lambda i: (i, 0)),
            ),
            compiler_params=pltpu.CompilerParams(
                dimension_semantics=("parallel",),
                vmem_limit_bytes=vmem_limit),
            cost_estimate=cost,
        )(x2d, w1p, b1p, w2p, b2p)
    else:
        # d_ff slab: exact divisor of Fp (no wasted zero matmul / DMA).
        tf = _pick_tf(Fp, max(128, tf))

        def streaming_bytes(tm_, tf_):
            return (2 * tm_ * Hp * xi              # x, double-buffered
                    + 2 * tm_ * Hp * xi            # out, double-buffered
                    + 4 * Hp * tf_ * wi            # W1 + W2 slabs, double-buffered
                    + 2 * (tf_ + Hp) * 4           # bias slabs
                    + tm_ * Hp * 4                 # f32 accumulator scratch
                    + 2 * tm_ * tf_ * 4)           # f32 h/g intermediates

        for _ in range(16):
            if streaming_bytes(tm, tf) <= vmem_budget:
                break
            if tf > 256:
                tf = _pick_tf(Fp, tf // 2)
            elif tm > 256:
                tm = _round_up(tm // 2, 8)
            else:
                break
        grid_m = pl.cdiv(M, tm)
        grid = (grid_m, Fp // tf)

        cost = pl.CostEstimate(
            flops=flops, transcendentals=transc,
            bytes_accessed=(M * Hp * xi
                            + grid_m * 2 * Hp * Fp * wi    # W slabs per row tile
                            + M * Hp * xi))
        out = pl.pallas_call(
            ffn_streaming_kernel,
            out_shape=jax.ShapeDtypeStruct((M, Hp), x.dtype),
            grid_spec=pltpu.PrefetchScalarGridSpec(
                num_scalar_prefetch=0,
                grid=grid,
                in_specs=[
                    pl.BlockSpec((tm, Hp), lambda i, f: (i, 0)),   # x row tile
                    pl.BlockSpec((Hp, tf), lambda i, f: (0, f)),   # W1 d_ff slab
                    pl.BlockSpec((1, tf), lambda i, f: (0, f)),    # b1 slab
                    pl.BlockSpec((tf, Hp), lambda i, f: (f, 0)),   # W2 d_ff slab
                    pl.BlockSpec((1, Hp), lambda i, f: (0, 0)),    # b2 (resident)
                ],
                out_specs=pl.BlockSpec((tm, Hp), lambda i, f: (i, 0)),
                scratch_shapes=[pltpu.VMEM((tm, Hp), jnp.float32)],
            ),
            compiler_params=pltpu.CompilerParams(
                dimension_semantics=("parallel", "arbitrary"),
                vmem_limit_bytes=vmem_limit),
            cost_estimate=cost,
        )(x2d, w1p, b1p, w2p, b2p)

    return out[:, :H].reshape(B, S, H)


# ----------------------------- reference & demo ------------------------------


def _ref_ffn(x, w1, b1, w2, b2):
    xf = x.astype(jnp.float32)
    w1f = w1.astype(jnp.float32)
    w2f = w2.astype(jnp.float32)
    h = jnp.einsum("bsh,hf->bsf", xf, w1f,
                   precision=jax.lax.Precision.HIGHEST) + b1
    g = _gelu_tanh(h)
    return jnp.einsum("bsf,fh->bsh", g, w2f,
                      precision=jax.lax.Precision.HIGHEST) + b2


def _make_params(key, hidden, ff_hidden):
    k1, k2, k3, k4 = jax.random.split(key, 4)
    # nn.Linear init: U(-1/sqrt(fan_in), 1/sqrt(fan_in)); weights stored
    # pre-transposed as (in, out) for the kernel. bf16 weights, f32 biases.
    b1_bound = 1.0 / math.sqrt(hidden)
    w1 = jax.random.uniform(k1, (hidden, ff_hidden), jnp.float32,
                            -b1_bound, b1_bound).astype(jnp.bfloat16)
    b1 = jax.random.uniform(k2, (ff_hidden,), jnp.float32, -b1_bound, b1_bound)
    b2_bound = 1.0 / math.sqrt(ff_hidden)
    w2 = jax.random.uniform(k3, (ff_hidden, hidden), jnp.float32,
                            -b2_bound, b2_bound).astype(jnp.bfloat16)
    b2 = jax.random.uniform(k4, (hidden,), jnp.float32, -b2_bound, b2_bound)
    return w1, b1, w2, b2


if __name__ == "__main__":
    key = jax.random.PRNGKey(0)
    k_a, k_b, k_c, k_d = jax.random.split(key, 4)

    # --- check 1: tiny shape (exercises the weight-resident schedule) -------
    batch, seq, hidden, ff_hidden = 2, 8, 32, 64
    x = jax.random.normal(k_a, (batch, seq, hidden),
                          dtype=jnp.float32).astype(jnp.bfloat16)
    w1, b1, w2, b2 = _make_params(k_b, hidden, ff_hidden)

    y = positionwise_ffn(x, w1, b1, w2, b2)
    y = jax.block_until_ready(y)
    y_ref = _ref_ffn(x, w1, b1, w2, b2)
    assert y.shape == (batch, seq, hidden)
    assert y.dtype == x.dtype
    assert jnp.allclose(y.astype(jnp.float32), y_ref, atol=3e-2, rtol=3e-2), \
        "resident-schedule mismatch vs reference"

    # --- check 2: small shape forced onto the streaming (d_ff-reduction) path
    batch2, seq2, hidden2, ff2 = 2, 16, 128, 512
    x2 = jax.random.normal(k_c, (batch2, seq2, hidden2),
                           dtype=jnp.float32).astype(jnp.bfloat16)
    w1b, b1b, w2b, b2b = _make_params(k_d, hidden2, ff2)

    y2 = positionwise_ffn(x2, w1b, b1b, w2b, b2b, tf=256, force_streaming=True)
    y2 = jax.block_until_ready(y2)
    y2_ref = _ref_ffn(x2, w1b, b1b, w2b, b2b)
    assert y2.shape == (batch2, seq2, hidden2)
    assert y2.dtype == x2.dtype
    assert jnp.allclose(y2.astype(jnp.float32), y2_ref, atol=3e-2, rtol=3e-2), \
        "streaming-schedule mismatch vs reference"

    print("KERNEL_OK")
</pallas_src>

<mosaic_0001>
module attributes {stable_mosaic.version = 11 : i64} {
  func.func @ffn_resident_kernel(%arg0: i32, %arg1: memref<16x128xbf16, #tpu.memory_space<vmem>>, %arg2: memref<128x128xbf16, #tpu.memory_space<vmem>>, %arg3: memref<1x128xf32, #tpu.memory_space<vmem>>, %arg4: memref<128x128xbf16, #tpu.memory_space<vmem>>, %arg5: memref<1x128xf32, #tpu.memory_space<vmem>>, %arg6: memref<16x128xbf16, #tpu.memory_space<vmem>>) attributes {dimension_semantics = [#tpu.dimension_semantics<parallel>], iteration_bounds = array<i64: 1>, scalar_prefetch = 0 : i64, scratch_operands = 0 : i64, tpu.core_type = #tpu.core_type<tc>, window_params = [{transform_indices = @transform_0, window_bounds = array<i64: 16, 128>}, {pipeline_mode = #tpu.pipeline_mode<synchronous>, transform_indices = @transform_1, window_bounds = array<i64: 128, 128>}, {pipeline_mode = #tpu.pipeline_mode<synchronous>, transform_indices = @transform_2, window_bounds = array<i64: 1, 128>}, {pipeline_mode = #tpu.pipeline_mode<synchronous>, transform_indices = @transform_3, window_bounds = array<i64: 128, 128>}, {pipeline_mode = #tpu.pipeline_mode<synchronous>, transform_indices = @transform_4, window_bounds = array<i64: 1, 128>}, {transform_indices = @transform_5, window_bounds = array<i64: 16, 128>}]} {
    %c0 = arith.constant 0 : index
    %c0_0 = arith.constant 0 : index
    %0 = vector.load %arg1[%c0, %c0_0] : memref<16x128xbf16, #tpu.memory_space<vmem>>, vector<16x128xbf16>
    %c0_1 = arith.constant 0 : index
    %c0_2 = arith.constant 0 : index
    %1 = vector.load %arg2[%c0_1, %c0_2] : memref<128x128xbf16, #tpu.memory_space<vmem>>, vector<128x128xbf16>
    %cst = arith.constant dense<0.000000e+00> : vector<16x128xf32>
    %2 = tpu.matmul %0, %1, %cst {dimension_numbers = #tpu.dot_dimension_numbers<[1], [0], [0], [1], [0, 0, 1, 1], [], []>} : vector<16x128xbf16>, vector<128x128xbf16>, vector<16x128xf32> -> vector<16x128xf32>
    %c0_3 = arith.constant 0 : index
    %c0_4 = arith.constant 0 : index
    %3 = vector.load %arg3[%c0_3, %c0_4] : memref<1x128xf32, #tpu.memory_space<vmem>>, vector<1x128xf32>
    %4 = vector.broadcast %3 : vector<1x128xf32> to vector<16x128xf32>
    %5 = arith.addf %2, %4 : vector<16x128xf32>
    %cst_5 = arith.constant 5.000000e-01 : f32
    %6 = vector.broadcast %cst_5 : f32 to vector<16x128xf32>
    %7 = arith.mulf %6, %5 : vector<16x128xf32>
    %cst_6 = arith.constant 4.471500e-02 : f32
    %8 = vector.broadcast %cst_6 : f32 to vector<16x128xf32>
    %9 = arith.mulf %8, %5 : vector<16x128xf32>
    %10 = arith.mulf %9, %5 : vector<16x128xf32>
    %11 = arith.mulf %10, %5 : vector<16x128xf32>
    %12 = arith.addf %5, %11 : vector<16x128xf32>
    %cst_7 = arith.constant 0.797884583 : f32
    %13 = vector.broadcast %cst_7 : f32 to vector<16x128xf32>
    %14 = arith.mulf %13, %12 : vector<16x128xf32>
    %15 = math.tanh %14 : vector<16x128xf32>
    %cst_8 = arith.constant 1.000000e+00 : f32
    %16 = vector.broadcast %cst_8 : f32 to vector<16x128xf32>
    %17 = arith.addf %16, %15 : vector<16x128xf32>
    %18 = arith.mulf %7, %17 : vector<16x128xf32>
    %19 = arith.truncf %18 : vector<16x128xf32> to vector<16x128xbf16>
    %c0_9 = arith.constant 0 : index
    %c0_10 = arith.constant 0 : index
    %20 = vector.load %arg4[%c0_9, %c0_10] : memref<128x128xbf16, #tpu.memory_space<vmem>>, vector<128x128xbf16>
    %cst_11 = arith.constant dense<0.000000e+00> : vector<16x128xf32>
    %21 = tpu.matmul %19, %20, %cst_11 {dimension_numbers = #tpu.dot_dimension_numbers<[1], [0], [0], [1], [0, 0, 1, 1], [], []>} : vector<16x128xbf16>, vector<128x128xbf16>, vector<16x128xf32> -> vector<16x128xf32>
    %c0_12 = arith.constant 0 : index
    %c0_13 = arith.constant 0 : index
    %22 = vector.load %arg5[%c0_12, %c0_13] : memref<1x128xf32, #tpu.memory_space<vmem>>, vector<1x128xf32>
    %23 = vector.broadcast %22 : vector<1x128xf32> to vector<16x128xf32>
    %24 = arith.addf %21, %23 : vector<16x128xf32>
    %25 = arith.truncf %24 : vector<16x128xf32> to vector<16x128xbf16>
    %c0_14 = arith.constant 0 : index
    %c0_15 = arith.constant 0 : index
    %26 = vector.load %arg6[%c0_14, %c0_15] : memref<16x128xbf16, #tpu.memory_space<vmem>>, vector<16x128xbf16>
    tpu.vector_store %arg6[%c0_14, %c0_15], %25 {strides = array<i32>} : memref<16x128xbf16, #tpu.memory_space<vmem>>, vector<16x128xbf16>,
    return
  }
  func.func @transform_0(%arg0: i32) -> (i32, i32) {
    %c0_i32 = arith.constant 0 : i32
    %c0_i32_0 = arith.constant 0 : i32
    return %arg0, %c0_i32 : i32, i32
  }
  func.func @transform_1(%arg0: i32) -> (i32, i32) {
    %c0_i32 = arith.constant 0 : i32
    %c0_i32_0 = arith.constant 0 : i32
    %c0_i32_1 = arith.constant 0 : i32
    return %c0_i32, %c0_i32_0 : i32, i32
  }
  func.func @transform_2(%arg0: i32) -> (i32, i32) {
    %c0_i32 = arith.constant 0 : i32
    %c0_i32_0 = arith.constant 0 : i32
    %c0_i32_1 = arith.constant 0 : i32
    return %c0_i32, %c0_i32_0 : i32, i32
  }
  func.func @transform_3(%arg0: i32) -> (i32, i32) {
    %c0_i32 = arith.constant 0 : i32
    %c0_i32_0 = arith.constant 0 : i32
    %c0_i32_1 = arith.constant 0 : i32
    return %c0_i32, %c0_i32_0 : i32, i32
  }
  func.func @transform_4(%arg0: i32) -> (i32, i32) {
    %c0_i32 = arith.constant 0 : i32
    %c0_i32_0 = arith.constant 0 : i32
    %c0_i32_1 = arith.constant 0 : i32
    return %c0_i32, %c0_i32_0 : i32, i32
  }
  func.func @transform_5(%arg0: i32) -> (i32, i32) {
    %c0_i32 = arith.constant 0 : i32
    %c0_i32_0 = arith.constant 0 : i32
    return %arg0, %c0_i32 : i32, i32
  }
}

</mosaic_0001>

<bundles_post_ra>
// kernel: tpu_custom_call.1
= control target key start
LH: loop header
LB: loop body
LE: loop exit
PB: predicated region body
PF: predicated region fallthrough
CT: control target
= control target key end

     0   :  { %10 = vsyncpa [#allocation3], 0  ;;  %s553_s0 = inlined_call_operand.hbm [shape: bf16[16,128], index: 0, kind: input, shape index: {}]   ;;  %s554_s1 = inlined_call_operand.hbm [shape: bf16[128,128], index: 1, kind: input, shape index: {}]   ;;  %s555_s2 = inlined_call_operand.vmem [shape: f32[1,128], index: 2, kind: input, shape index: {}]   ;;  %s556_s3 = inlined_call_operand.hbm [shape: bf16[128,128], index: 3, kind: input, shape index: {}]   ;;  %s557_s4 = inlined_call_operand.vmem [shape: f32[1,128], index: 4, kind: input, shape index: {}]   ;;  %s558_s5 = inlined_call_operand.hbm [shape: bf16[16,128], index: 5, kind: output, shape index: {}]  }
   0x1   :  { %11 = vsyncpa [#allocation6], 0 }
   0x2   :  { %12 = vsyncpa [#allocation4], 0  ;;  %s30_s20 = sshll.u32 %s554_s1, 4  ;;  %s487_s21 = smov [#allocation5]   ;;  %s31_s20 = int_to_ptr.hbm [resolvable:$true] %s30_s20 }
   0x3   :  { %s32_s22 = sshll.u32 %s487_s21, 4  ;;  %s17_s25 = sshll.u32 %s553_s0, 4  ;;  %s33_s22 = int_to_ptr.vmem [resolvable:$true] %s32_s22  ;;  %s18_s25 = int_to_ptr.hbm [resolvable:$true] %s17_s25 }
   0x4   :  { %s488_s26 = smov 64   ;;  %s489_s27 = smov 4  }
   0x5   :  { %38 = dma.hbm_to_vmem [thread:$0]  %s31_s20, 1024, %s33_s22, [#allocation6], %s488_s26, %s488_s26, %s489_s27  }
   0x6   :  { %s490_s28 = smov [#allocation2]   ;;  %s45_s1 = sshll.u32 %s556_s3, 4  ;;  %s46_s1 = int_to_ptr.hbm [resolvable:$true] %s45_s1 }
   0x7   :  { %s19_s29 = sshll.u32 %s490_s28, 4  ;;  %s491_s0 = smov [#allocation7]   ;;  %s20_s29 = int_to_ptr.vmem [resolvable:$true] %s19_s29 }
   0x8   :  { %25 = dma.hbm_to_vmem [thread:$0]  %s18_s25, 128, %s20_s29, [#allocation3], %s488_s26, %s488_s26, %s489_s27  }
   0x9   :  { %s47_s7 = sshll.u32 %s491_s0, 4  ;;  %s48_s7 = int_to_ptr.vmem [resolvable:$true] %s47_s7 }
   0xa   :  { %53 = dma.hbm_to_vmem [thread:$0]  %s46_s1, 1024, %s48_s7, [#allocation6], %s488_s26, %s488_s26, %s489_s27  }
   0xb   :  { %481 = dma.done.wait [#allocation3], 128  }
   0xc   :  { %482 = vsyncadd [#allocation3], 4294967168 }
   0xd   :  { %483 = dma.done.wait [#allocation6], 2048  }
   0xe   :  { %484 = vsyncadd [#allocation6], 4294965248  ;;  %v359_v0 = vld [vmem:[#allocation5 + $0x38] sm:$0xff]  ;;  %v358_v1 = vld [vmem:[#allocation5 + $0x30] sm:$0xff]  ;;  %s492_s10 = smov [#allocation8]   ;;  %s269_s14 = sshll.u32 %s558_s5, 4  ;;  %s270_s14 = int_to_ptr.hbm [resolvable:$true] %s269_s14 }
   0xf   :  { %144 = vmatpush.bf16.msra.mxu0 %v359_v0  ;;  %v357_v2 = vld [vmem:[#allocation5 + $0x28] sm:$0xff]  ;;  %v356_v3 = vld [vmem:[#allocation5 + $0x20] sm:$0xff]  ;;  %v355_v4 = vld [vmem:[#allocation5 + $0x18] sm:$0xff]  ;;  %s267_s11 = sshll.u32 %s492_s10, 4  ;;  %s268_s11 = int_to_ptr.vmem [resolvable:$true] %s267_s11 }
  0x10   :  { %v354_v5 = vld [vmem:[#allocation5 + $0x10] sm:$0xff]  ;;  %v353_v6 = vld [vmem:[#allocation5 + $0x8] sm:$0xff]  ;;  %v352_v7 = vld [vmem:[#allocation5] sm:$0xff] }
  0x11   :  { %v351_v8 = vld [vmem:[#allocation2] sm:$0xff]  ;;  %v366_v10 = vld [vmem:[#allocation7 + $0x30] sm:$0xff]  ;;  %v365_v11 = vld [vmem:[#allocation7 + $0x28] sm:$0xff] }
  0x12   :  { %v367_v9 = vld [vmem:[#allocation7 + $0x38] sm:$0xff]  ;;  %v364_v12 = vld [vmem:[#allocation7 + $0x20] sm:$0xff]  ;;  %v362_v14 = vld [vmem:[#allocation7 + $0x10] sm:$0xff] }
  0x13   :  { %145 = vmatpush.bf16.msra.mxu0 %v358_v1  ;;  %245 = vmatpush.bf16.msra.mxu1 %v367_v9  ;;  %v363_v13 = vld [vmem:[#allocation7 + $0x18] sm:$0xff]  ;;  %v361_v15 = vld [vmem:[#allocation7 + $0x8] sm:$0xff]  ;;  %v360_v16 = vld [vmem:[#allocation7] sm:$0xff] }
  0x14   :  { %v379_v17 = vld [vmem:[%s555_s2] ss:$0 sm:$0xff] }
  0x15   :  { %v380_v42 = vld [vmem:[%s557_s4] ss:$0 sm:$0xff] }
  0x17   :  { %146 = vmatpush.bf16.msra.mxu0 %v357_v2  ;;  %246 = vmatpush.bf16.msra.mxu1 %v366_v10 }
  0x1b   :  { %147 = vmatpush.bf16.msra.mxu0 %v356_v3  ;;  %247 = vmatpush.bf16.msra.mxu1 %v365_v11 }
  0x1f   :  { %148 = vmatpush.bf16.msra.mxu0 %v355_v4  ;;  %248 = vmatpush.bf16.msra.mxu1 %v364_v12 }
  0x23   :  { %149 = vmatpush.bf16.msra.mxu0 %v354_v5  ;;  %249 = vmatpush.bf16.msra.mxu1 %v363_v13 }
  0x27   :  { %150 = vmatpush.bf16.msra.mxu0 %v353_v6  ;;  %250 = vmatpush.bf16.msra.mxu1 %v362_v14 }
  0x2b   :  { %151 = vmatpush.bf16.msra.mxu0 %v352_v7  ;;  %251 = vmatpush.bf16.msra.mxu1 %v361_v15 }
  0x2e   :  { %152 = vmatmul.bf16.vlgmr.msra.gmra.mxu0 %v351_v8 }
  0x2f   :  { %252 = vmatpush.bf16.msra.mxu1 %v360_v16 }
  0xab   :  { %v153_v18 = vpop.f32.mrf.mxu0 }
  0xac   :  { %v154_v19 = vadd.f32 %v379_v17, %v153_v18 }
  0xae   :  { %v160_v20 = vmul.f32 0.044715, %v154_v19  ;;  %v158_v35 = vmul.f32 0.5, %v154_v19 }
  0xb0   :  { %v162_v21 = vmul.f32 %v160_v20, %v154_v19 }
  0xb2   :  { %v164_v22 = vmul.f32 %v162_v21, %v154_v19 }
  0xb3   :  { %v155_v23 = vpop.f32.mrf.mxu0 }
  0xb4   :  { %v156_v24 = vadd.f32 %v379_v17, %v155_v23  ;;  %v166_v25 = vadd.f32 %v164_v22, %v154_v19 }
  0xb6   :  { %v161_v26 = vmul.f32 0.044715, %v156_v24  ;;  %v168_v28 = vmul.f32 0.7978846, %v166_v25  ;;  %v159_v36 = vmul.f32 0.5, %v156_v24 }
  0xb8   :  { %v163_v27 = vmul.f32 %v161_v26, %v156_v24  ;;  %381 = vtanh.f32 %v168_v28 }
  0xba   :  { %v165_v29 = vmul.f32 %v163_v27, %v156_v24 }
  0xbc   :  { %v167_v30 = vadd.f32 %v165_v29, %v156_v24 }
  0xbe   :  { %v169_v31 = vmul.f32 0.7978846, %v167_v30  ;;  %v382_v32 = vpop.eup %381 }
  0xbf   :  { %v172_v33 = vadd.f32 1.0, %v382_v32 }
  0xc0   :  { %383 = vtanh.f32 %v169_v31 }
  0xc1   :  { %v174_v38 = vmul.f32 %v172_v33, %v158_v35 }
  0xc6   :  { %v384_v34 = vpop.eup %383 }
  0xc7   :  { %v173_v37 = vadd.f32 1.0, %v384_v34 }
  0xc9   :  { %v175_v39 = vmul.f32 %v173_v37, %v159_v36 }
  0xcb   :  { %v176_v40 = vpack.c.bf16 %v175_v39, %v174_v38 }
  0xcd   :  { %253 = vmatmul.bf16.vlgmr.msra.gmra.mxu1 %v176_v40 }
 0x14a   :  { %v254_v41 = vpop.f32.mrf.mxu1 }
 0x14b   :  { %v255_v44 = vadd.f32 %v380_v42, %v254_v41 }
 0x152   :  { %v256_v43 = vpop.f32.mrf.mxu1 }
 0x153   :  { %v257_v45 = vadd.f32 %v380_v42, %v256_v43 }
 0x155   :  { %v371_v46 = vpack.c.bf16 %v257_v45, %v255_v44 }
 0x157   :  { %372 = vst [vmem:[#allocation8] sm:$0xff] %v371_v46  }
 0x158   :  { %275 = dma.vmem_to_hbm [thread:$0]  %s268_s11, 128, %s270_s14, [#allocation4], %s488_s26, %s488_s26, %s489_s27  }
 0x159   :  { %485 = dma.done.wait [#allocation4], 128  }
 0x15a   :  { %486 = vsyncadd [#allocation4], 4294967168 }
 0x15b   :  { %280 = vsyncpa [#allocation3], 1 }
 0x15c   :  { %281 = vsyncpa [#allocation6], 1 }
 0x15d   :  { %282 = vsyncpa [#allocation4], 1 }

</bundles_post_ra>
